<compile_context>
chip_gen: v5e
topology: v5e:2x2
jax: 0.10.0
libtpu: 0.0.40
codegen_flags: <defaults>
</compile_context>

<pallas_src>
import functools

import jax
import jax.numpy as jnp
from jax import lax
from jax.experimental import pallas as pl
from jax.experimental.pallas import tpu as pltpu


# ----------------------------------------------------------------------------
# Pallas kernel: single-layer LSTM recurrence + Linear head, fully fused
# ----------------------------------------------------------------------------
def _lstm_fc_kernel(x_ref, wih_ref, whh_ref, b_ref, fcw_ref, fcb_ref,
                    o_ref, xw_ref, *, T, B):
    """Fused LSTM (layer 0) + FC head for one batch block of B rows.

    x_ref  : (T*B, D)   bf16  time-major input block (rows = t*B + b)
    wih_ref: (D, 4H)    bf16  fused input weights,  gate order (i, f, o, g)
    whh_ref: (H, 4H)    bf16  fused hidden weights, gate order (i, f, o, g)
    b_ref  : (1, 4H)    f32   fused bias (b_ih + b_hh)
    fcw_ref: (1, H)     f32   FC weight (row vector)
    fcb_ref: (1, 1)     f32   FC bias
    o_ref  : (B, 1)     f32   output  fc(h_T)
    xw_ref : (T*B, 4H)  f32   VMEM scratch: precomputed input projections
    """
    H = whh_ref.shape[0]

    # --- input projection for ALL timesteps: off the serial critical path ---
    # bf16 x bf16 on the MXU, f32 accumulation.
    xw_ref[...] = (
        jnp.dot(x_ref[...], wih_ref[...], preferred_element_type=jnp.float32)
        + b_ref[...]
    )

    whh = whh_ref[...]  # hoist the recurrent weight load out of the loop (bf16)

    def step(t, carry):
        h, c = carry                                   # f32 (B, H)
        row = pl.multiple_of(t * B, B)
        z = xw_ref[pl.ds(row, B), :] + jnp.dot(
            h.astype(jnp.bfloat16), whh,
            preferred_element_type=jnp.float32)        # (B, 4H) f32
        # gate order (i, f, o, g): one tanh-based sigmoid over (B, 3H)
        # (single EUP push, no divide) and one tanh over (B, H).
        s = 0.5 * jnp.tanh(0.5 * z[:, 0:3 * H]) + 0.5
        i_g = s[:, 0:H]
        f_g = s[:, H:2 * H]
        o_g = s[:, 2 * H:3 * H]
        g_g = jnp.tanh(z[:, 3 * H:4 * H])
        c_new = f_g * c + i_g * g_g
        h_new = o_g * jnp.tanh(c_new)
        return (h_new, c_new)

    h0 = jnp.zeros((B, H), jnp.float32)
    c0 = jnp.zeros((B, H), jnp.float32)
    h_fin, _ = lax.fori_loop(0, T, step, (h0, c0), unroll=min(T, 8))

    # --- FC head epilogue: VPU multiply + lane reduction (no MXU push) ---
    prod = h_fin * fcw_ref[...]                        # (B, H) * (1, H)
    o_ref[...] = jnp.sum(prod, axis=-1, keepdims=True) + fcb_ref[...]


def lstm_forward(x, params, batch_block=8):
    """x: (B, T, F) batch-first f32.  Returns (B,) f32 == fc(hn[0]).flatten()."""
    B, T, F_ = x.shape
    bt = max(8, int(batch_block))
    bt = ((bt + 7) // 8) * 8                 # sublane-aligned per-program rows
    Bp = ((B + bt - 1) // bt) * bt           # padded batch
    G = Bp // bt                             # batch grid size

    layer0 = params["layers"][0]             # hn[0] depends only on layer 0
    H = layer0["whh"].shape[0]

    x_tm = jnp.transpose(x, (1, 0, 2)).astype(jnp.float32)     # (T, B, F)
    if Bp != B:
        x_tm = jnp.pad(x_tm, ((0, 0), (0, Bp - B), (0, 0)))
    # (T, Bp, F) -> (G, T*bt, F): program j owns batch rows [j*bt, (j+1)*bt),
    # time-major inside the block so step t reads a contiguous (bt, 4H) slice.
    x_blk = (x_tm.reshape(T, G, bt, F_).transpose(1, 0, 2, 3)
                 .reshape(G, T * bt, F_).astype(jnp.bfloat16))

    wih = layer0["wih"].astype(jnp.bfloat16)
    whh = layer0["whh"].astype(jnp.bfloat16)

    grid_spec = pltpu.PrefetchScalarGridSpec(
        num_scalar_prefetch=0,
        grid=(G,),
        in_specs=[
            pl.BlockSpec((None, T * bt, F_), lambda j: (j, 0, 0)),   # x block
            pl.BlockSpec((F_, 4 * H), lambda j: (0, 0)),             # wih
            pl.BlockSpec((H, 4 * H), lambda j: (0, 0)),              # whh
            pl.BlockSpec((1, 4 * H), lambda j: (0, 0)),              # bias
            pl.BlockSpec((1, H), lambda j: (0, 0)),                  # fc_w
            pl.BlockSpec((1, 1), lambda j: (0, 0)),                  # fc_b
        ],
        out_specs=pl.BlockSpec((None, bt, 1), lambda j: (j, 0, 0)),
        scratch_shapes=[pltpu.VMEM((T * bt, 4 * H), jnp.float32)],
    )

    out = pl.pallas_call(
        functools.partial(_lstm_fc_kernel, T=T, B=bt),
        out_shape=jax.ShapeDtypeStruct((G, bt, 1), jnp.float32),
        grid_spec=grid_spec,
        compiler_params=pltpu.CompilerParams(
            dimension_semantics=("parallel",)),      # v7x: 2 TCs take G blocks
    )(x_blk, wih, whh, layer0["b"], params["fc_w"], params["fc_b"])

    return out.reshape(Bp)[:B]


# ----------------------------------------------------------------------------
# Parameter setup (deterministic, PyTorch-style uniform init, fused layout)
# ----------------------------------------------------------------------------
def init_params(key, num_features, hidden_size, num_layers):
    params = {"layers": []}
    H = hidden_size
    bound = 1.0 / jnp.sqrt(H)
    reorder = jnp.array([0, 1, 3, 2])   # PyTorch (i,f,g,o) -> kernel (i,f,o,g)
    for layer in range(num_layers):
        d_in = num_features if layer == 0 else H
        key, k1, k2, k3, k4 = jax.random.split(key, 5)
        # PyTorch layout: weight_ih (4H, D_in), weight_hh (4H, H), biases (4H,)
        w_ih = jax.random.uniform(k1, (4 * H, d_in), jnp.float32, -bound, bound)
        w_hh = jax.random.uniform(k2, (4 * H, H), jnp.float32, -bound, bound)
        b_ih = jax.random.uniform(k3, (4 * H,), jnp.float32, -bound, bound)
        b_hh = jax.random.uniform(k4, (4 * H,), jnp.float32, -bound, bound)
        # Fused kernel layout: wih (D_in, 4H), whh (H, 4H), b (1, 4H)
        wih_f = jnp.transpose(w_ih.reshape(4, H, d_in)[reorder],
                              (2, 0, 1)).reshape(d_in, 4 * H)
        whh_f = jnp.transpose(w_hh.reshape(4, H, H)[reorder],
                              (2, 0, 1)).reshape(H, 4 * H)
        b_f = (b_ih + b_hh).reshape(4, H)[reorder].reshape(1, 4 * H)
        params["layers"].append({"wih": wih_f, "whh": whh_f, "b": b_f})
    key, k5, k6 = jax.random.split(key, 3)
    params["fc_w"] = jax.random.uniform(k5, (1, H), jnp.float32, -bound, bound)
    params["fc_b"] = jax.random.uniform(k6, (1,), jnp.float32,
                                        -bound, bound).reshape(1, 1)
    return params


# ----------------------------------------------------------------------------
# Pure-JAX f32 reference (PyTorch math on the same fused parameters)
# ----------------------------------------------------------------------------
def lstm_reference(x, params):
    B, _, _ = x.shape
    x_tm = jnp.transpose(x, (1, 0, 2)).astype(jnp.float32)
    layer0 = params["layers"][0]
    wih, whh, b = layer0["wih"], layer0["whh"], layer0["b"]
    H = whh.shape[0]

    def step(carry, x_t):
        h, c = carry
        z = x_t @ wih + b + h @ whh
        s = 1.0 / (1.0 + jnp.exp(-z[:, 0:3 * H]))
        i_g, f_g, o_g = s[:, 0:H], s[:, H:2 * H], s[:, 2 * H:3 * H]
        g_g = jnp.tanh(z[:, 3 * H:4 * H])
        c_new = f_g * c + i_g * g_g
        h_new = o_g * jnp.tanh(c_new)
        return (h_new, c_new), None

    init = (jnp.zeros((B, H), jnp.float32), jnp.zeros((B, H), jnp.float32))
    (h_fin, _), _ = lax.scan(step, init, x_tm)
    return (h_fin @ params["fc_w"].T + params["fc_b"]).reshape(-1)


# ----------------------------------------------------------------------------
if __name__ == "__main__":
    # batch_size=16 per the original script; T=8, F=4, H=32, 2 LSTM layers.
    B, T, F, H, L = 16, 8, 4, 32, 2

    key = jax.random.PRNGKey(0)
    key, kx, kp = jax.random.split(key, 3)
    x = jax.random.normal(kx, (B, T, F), jnp.float32)
    params = init_params(kp, F, H, L)

    fwd = jax.jit(functools.partial(lstm_forward, params=params))
    out = fwd(x)
    jax.block_until_ready(out)

    ref = lstm_reference(x, params)
    assert out.shape == (B,), out.shape
    # bf16 MXU matmuls (f32 accumulate) -> loosened tolerance vs the f32 ref.
    assert jnp.allclose(out, ref, rtol=3e-2, atol=3e-2), (out, ref)

    print("KERNEL_OK")
</pallas_src>

<mosaic_0001>
module attributes {stable_mosaic.version = 11 : i64} {
  func.func @_lstm_fc_kernel(%arg0: i32, %arg1: memref<1x64x4xbf16, #tpu.memory_space<vmem>>, %arg2: memref<4x128xbf16, #tpu.memory_space<vmem>>, %arg3: memref<32x128xbf16, #tpu.memory_space<vmem>>, %arg4: memref<1x128xf32, #tpu.memory_space<vmem>>, %arg5: memref<1x32xf32, #tpu.memory_space<vmem>>, %arg6: memref<1x1xf32, #tpu.memory_space<vmem>>, %arg7: memref<1x8x1xf32, #tpu.memory_space<vmem>>, %arg8: memref<64x128xf32, #tpu.memory_space<vmem>>) attributes {dimension_semantics = [#tpu.dimension_semantics<parallel>], iteration_bounds = array<i64: 2>, scalar_prefetch = 0 : i64, scratch_operands = 1 : i64, tpu.core_type = #tpu.core_type<tc>, window_params = [{transform_indices = @transform_0, window_bounds = array<i64: 1, 64, 4>}, {pipeline_mode = #tpu.pipeline_mode<synchronous>, transform_indices = @transform_1, window_bounds = array<i64: 4, 128>}, {pipeline_mode = #tpu.pipeline_mode<synchronous>, transform_indices = @transform_2, window_bounds = array<i64: 32, 128>}, {pipeline_mode = #tpu.pipeline_mode<synchronous>, transform_indices = @transform_3, window_bounds = array<i64: 1, 128>}, {pipeline_mode = #tpu.pipeline_mode<synchronous>, transform_indices = @transform_4, window_bounds = array<i64: 1, 32>}, {pipeline_mode = #tpu.pipeline_mode<synchronous>, transform_indices = @transform_5, window_bounds = array<i64: 1, 1>}, {transform_indices = @transform_6, window_bounds = array<i64: 1, 8, 1>}]} {
    %c0 = arith.constant 0 : index
    %c0_0 = arith.constant 0 : index
    %c0_1 = arith.constant 0 : index
    %0 = vector.load %arg1[%c0, %c0_0, %c0_1] : memref<1x64x4xbf16, #tpu.memory_space<vmem>>, vector<1x64x4xbf16>
    %1 = vector.shape_cast %0 : vector<1x64x4xbf16> to vector<64x4xbf16>
    %c0_2 = arith.constant 0 : index
    %c0_3 = arith.constant 0 : index
    %2 = vector.load %arg2[%c0_2, %c0_3] : memref<4x128xbf16, #tpu.memory_space<vmem>>, vector<4x128xbf16>
    %cst = arith.constant dense<0.000000e+00> : vector<64x128xf32>
    %3 = tpu.matmul %1, %2, %cst {dimension_numbers = #tpu.dot_dimension_numbers<[1], [0], [0], [1], [0, 0, 1, 1], [], []>} : vector<64x4xbf16>, vector<4x128xbf16>, vector<64x128xf32> -> vector<64x128xf32>
    %c0_4 = arith.constant 0 : index
    %c0_5 = arith.constant 0 : index
    %4 = vector.load %arg4[%c0_4, %c0_5] : memref<1x128xf32, #tpu.memory_space<vmem>>, vector<1x128xf32>
    %5 = vector.broadcast %4 : vector<1x128xf32> to vector<64x128xf32>
    %6 = arith.addf %3, %5 : vector<64x128xf32>
    %c0_6 = arith.constant 0 : index
    %c0_7 = arith.constant 0 : index
    %7 = vector.load %arg8[%c0_6, %c0_7] : memref<64x128xf32, #tpu.memory_space<vmem>>, vector<64x128xf32>
    tpu.vector_store %arg8[%c0_6, %c0_7], %6 {strides = array<i32>} : memref<64x128xf32, #tpu.memory_space<vmem>>, vector<64x128xf32>,
    %c0_8 = arith.constant 0 : index
    %c0_9 = arith.constant 0 : index
    %8 = vector.load %arg3[%c0_8, %c0_9] : memref<32x128xbf16, #tpu.memory_space<vmem>>, vector<32x128xbf16>
    %cst_10 = arith.constant 0.000000e+00 : f32
    %9 = vector.broadcast %cst_10 : f32 to vector<8x32xf32>
    %cst_11 = arith.constant 0.000000e+00 : f32
    %10 = vector.broadcast %cst_11 : f32 to vector<8x32xf32>
    %c0_i32 = arith.constant 0 : i32
    %c8_i32 = arith.constant 8 : i32
    %11 = arith.muli %c0_i32, %c8_i32 : i32
    %12 = tpu.assume_multiple %11, 8 : i32
    %13 = arith.index_cast %12 : i32 to index
    %c0_12 = arith.constant 0 : index
    %14 = vector.load %arg8[%13, %c0_12] : memref<64x128xf32, #tpu.memory_space<vmem>>, vector<8x128xf32>
    %15 = arith.truncf %9 : vector<8x32xf32> to vector<8x32xbf16>
    %cst_13 = arith.constant dense<0.000000e+00> : vector<8x128xf32>
    %16 = tpu.matmul %15, %8, %cst_13 {dimension_numbers = #tpu.dot_dimension_numbers<[1], [0], [0], [1], [0, 0, 1, 1], [], []>} : vector<8x32xbf16>, vector<32x128xbf16>, vector<8x128xf32> -> vector<8x128xf32>
    %17 = arith.addf %14, %16 : vector<8x128xf32>
    %18 = vector.extract_strided_slice %17 {offsets = [0, 0], sizes = [8, 96], strides = [1, 1]} : vector<8x128xf32> to vector<8x96xf32>
    %cst_14 = arith.constant 5.000000e-01 : f32
    %19 = vector.broadcast %cst_14 : f32 to vector<8x96xf32>
    %20 = arith.mulf %19, %18 : vector<8x96xf32>
    %21 = math.tanh %20 : vector<8x96xf32>
    %cst_15 = arith.constant 5.000000e-01 : f32
    %22 = vector.broadcast %cst_15 : f32 to vector<8x96xf32>
    %23 = arith.mulf %22, %21 : vector<8x96xf32>
    %cst_16 = arith.constant 5.000000e-01 : f32
    %24 = vector.broadcast %cst_16 : f32 to vector<8x96xf32>
    %25 = arith.addf %23, %24 : vector<8x96xf32>
    %26 = vector.extract_strided_slice %25 {offsets = [0, 0], sizes = [8, 32], strides = [1, 1]} : vector<8x96xf32> to vector<8x32xf32>
    %27 = vector.extract_strided_slice %25 {offsets = [0, 32], sizes = [8, 32], strides = [1, 1]} : vector<8x96xf32> to vector<8x32xf32>
    %28 = vector.extract_strided_slice %25 {offsets = [0, 64], sizes = [8, 32], strides = [1, 1]} : vector<8x96xf32> to vector<8x32xf32>
    %29 = vector.extract_strided_slice %17 {offsets = [0, 96], sizes = [8, 32], strides = [1, 1]} : vector<8x128xf32> to vector<8x32xf32>
    %30 = math.tanh %29 : vector<8x32xf32>
    %31 = arith.mulf %27, %10 : vector<8x32xf32>
    %32 = arith.mulf %26, %30 : vector<8x32xf32>
    %33 = arith.addf %31, %32 : vector<8x32xf32>
    %34 = math.tanh %33 : vector<8x32xf32>
    %35 = arith.mulf %28, %34 : vector<8x32xf32>
    %c1_i32 = arith.constant 1 : i32
    %c8_i32_17 = arith.constant 8 : i32
    %36 = arith.muli %c1_i32, %c8_i32_17 : i32
    %37 = tpu.assume_multiple %36, 8 : i32
    %38 = arith.index_cast %37 : i32 to index
    %c0_18 = arith.constant 0 : index
    %39 = vector.load %arg8[%38, %c0_18] : memref<64x128xf32, #tpu.memory_space<vmem>>, vector<8x128xf32>
    %40 = arith.truncf %35 : vector<8x32xf32> to vector<8x32xbf16>
    %cst_19 = arith.constant dense<0.000000e+00> : vector<8x128xf32>
    %41 = tpu.matmul %40, %8, %cst_19 {dimension_numbers = #tpu.dot_dimension_numbers<[1], [0], [0], [1], [0, 0, 1, 1], [], []>} : vector<8x32xbf16>, vector<32x128xbf16>, vector<8x128xf32> -> vector<8x128xf32>
    %42 = arith.addf %39, %41 : vector<8x128xf32>
    %43 = vector.extract_strided_slice %42 {offsets = [0, 0], sizes = [8, 96], strides = [1, 1]} : vector<8x128xf32> to vector<8x96xf32>
    %cst_20 = arith.constant 5.000000e-01 : f32
    %44 = vector.broadcast %cst_20 : f32 to vector<8x96xf32>
    %45 = arith.mulf %44, %43 : vector<8x96xf32>
    %46 = math.tanh %45 : vector<8x96xf32>
    %cst_21 = arith.constant 5.000000e-01 : f32
    %47 = vector.broadcast %cst_21 : f32 to vector<8x96xf32>
    %48 = arith.mulf %47, %46 : vector<8x96xf32>
    %cst_22 = arith.constant 5.000000e-01 : f32
    %49 = vector.broadcast %cst_22 : f32 to vector<8x96xf32>
    %50 = arith.addf %48, %49 : vector<8x96xf32>
    %51 = vector.extract_strided_slice %50 {offsets = [0, 0], sizes = [8, 32], strides = [1, 1]} : vector<8x96xf32> to vector<8x32xf32>
    %52 = vector.extract_strided_slice %50 {offsets = [0, 32], sizes = [8, 32], strides = [1, 1]} : vector<8x96xf32> to vector<8x32xf32>
    %53 = vector.extract_strided_slice %50 {offsets = [0, 64], sizes = [8, 32], strides = [1, 1]} : vector<8x96xf32> to vector<8x32xf32>
    %54 = vector.extract_strided_slice %42 {offsets = [0, 96], sizes = [8, 32], strides = [1, 1]} : vector<8x128xf32> to vector<8x32xf32>
    %55 = math.tanh %54 : vector<8x32xf32>
    %56 = arith.mulf %52, %33 : vector<8x32xf32>
    %57 = arith.mulf %51, %55 : vector<8x32xf32>
    %58 = arith.addf %56, %57 : vector<8x32xf32>
    %59 = math.tanh %58 : vector<8x32xf32>
    %60 = arith.mulf %53, %59 : vector<8x32xf32>
    %c2_i32 = arith.constant 2 : i32
    %c8_i32_23 = arith.constant 8 : i32
    %61 = arith.muli %c2_i32, %c8_i32_23 : i32
    %62 = tpu.assume_multiple %61, 8 : i32
    %63 = arith.index_cast %62 : i32 to index
    %c0_24 = arith.constant 0 : index
    %64 = vector.load %arg8[%63, %c0_24] : memref<64x128xf32, #tpu.memory_space<vmem>>, vector<8x128xf32>
    %65 = arith.truncf %60 : vector<8x32xf32> to vector<8x32xbf16>
    %cst_25 = arith.constant dense<0.000000e+00> : vector<8x128xf32>
    %66 = tpu.matmul %65, %8, %cst_25 {dimension_numbers = #tpu.dot_dimension_numbers<[1], [0], [0], [1], [0, 0, 1, 1], [], []>} : vector<8x32xbf16>, vector<32x128xbf16>, vector<8x128xf32> -> vector<8x128xf32>
    %67 = arith.addf %64, %66 : vector<8x128xf32>
    %68 = vector.extract_strided_slice %67 {offsets = [0, 0], sizes = [8, 96], strides = [1, 1]} : vector<8x128xf32> to vector<8x96xf32>
    %cst_26 = arith.constant 5.000000e-01 : f32
    %69 = vector.broadcast %cst_26 : f32 to vector<8x96xf32>
    %70 = arith.mulf %69, %68 : vector<8x96xf32>
    %71 = math.tanh %70 : vector<8x96xf32>
    %cst_27 = arith.constant 5.000000e-01 : f32
    %72 = vector.broadcast %cst_27 : f32 to vector<8x96xf32>
    %73 = arith.mulf %72, %71 : vector<8x96xf32>
    %cst_28 = arith.constant 5.000000e-01 : f32
    %74 = vector.broadcast %cst_28 : f32 to vector<8x96xf32>
    %75 = arith.addf %73, %74 : vector<8x96xf32>
    %76 = vector.extract_strided_slice %75 {offsets = [0, 0], sizes = [8, 32], strides = [1, 1]} : vector<8x96xf32> to vector<8x32xf32>
    %77 = vector.extract_strided_slice %75 {offsets = [0, 32], sizes = [8, 32], strides = [1, 1]} : vector<8x96xf32> to vector<8x32xf32>
    %78 = vector.extract_strided_slice %75 {offsets = [0, 64], sizes = [8, 32], strides = [1, 1]} : vector<8x96xf32> to vector<8x32xf32>
    %79 = vector.extract_strided_slice %67 {offsets = [0, 96], sizes = [8, 32], strides = [1, 1]} : vector<8x128xf32> to vector<8x32xf32>
    %80 = math.tanh %79 : vector<8x32xf32>
    %81 = arith.mulf %77, %58 : vector<8x32xf32>
    %82 = arith.mulf %76, %80 : vector<8x32xf32>
    %83 = arith.addf %81, %82 : vector<8x32xf32>
    %84 = math.tanh %83 : vector<8x32xf32>
    %85 = arith.mulf %78, %84 : vector<8x32xf32>
    %c3_i32 = arith.constant 3 : i32
    %c8_i32_29 = arith.constant 8 : i32
    %86 = arith.muli %c3_i32, %c8_i32_29 : i32
    %87 = tpu.assume_multiple %86, 8 : i32
    %88 = arith.index_cast %87 : i32 to index
    %c0_30 = arith.constant 0 : index
    %89 = vector.load %arg8[%88, %c0_30] : memref<64x128xf32, #tpu.memory_space<vmem>>, vector<8x128xf32>
    %90 = arith.truncf %85 : vector<8x32xf32> to vector<8x32xbf16>
    %cst_31 = arith.constant dense<0.000000e+00> : vector<8x128xf32>
    %91 = tpu.matmul %90, %8, %cst_31 {dimension_numbers = #tpu.dot_dimension_numbers<[1], [0], [0], [1], [0, 0, 1, 1], [], []>} : vector<8x32xbf16>, vector<32x128xbf16>, vector<8x128xf32> -> vector<8x128xf32>
    %92 = arith.addf %89, %91 : vector<8x128xf32>
    %93 = vector.extract_strided_slice %92 {offsets = [0, 0], sizes = [8, 96], strides = [1, 1]} : vector<8x128xf32> to vector<8x96xf32>
    %cst_32 = arith.constant 5.000000e-01 : f32
    %94 = vector.broadcast %cst_32 : f32 to vector<8x96xf32>
    %95 = arith.mulf %94, %93 : vector<8x96xf32>
    %96 = math.tanh %95 : vector<8x96xf32>
    %cst_33 = arith.constant 5.000000e-01 : f32
    %97 = vector.broadcast %cst_33 : f32 to vector<8x96xf32>
    %98 = arith.mulf %97, %96 : vector<8x96xf32>
    %cst_34 = arith.constant 5.000000e-01 : f32
    %99 = vector.broadcast %cst_34 : f32 to vector<8x96xf32>
    %100 = arith.addf %98, %99 : vector<8x96xf32>
    %101 = vector.extract_strided_slice %100 {offsets = [0, 0], sizes = [8, 32], strides = [1, 1]} : vector<8x96xf32> to vector<8x32xf32>
    %102 = vector.extract_strided_slice %100 {offsets = [0, 32], sizes = [8, 32], strides = [1, 1]} : vector<8x96xf32> to vector<8x32xf32>
    %103 = vector.extract_strided_slice %100 {offsets = [0, 64], sizes = [8, 32], strides = [1, 1]} : vector<8x96xf32> to vector<8x32xf32>
    %104 = vector.extract_strided_slice %92 {offsets = [0, 96], sizes = [8, 32], strides = [1, 1]} : vector<8x128xf32> to vector<8x32xf32>
    %105 = math.tanh %104 : vector<8x32xf32>
    %106 = arith.mulf %102, %83 : vector<8x32xf32>
    %107 = arith.mulf %101, %105 : vector<8x32xf32>
    %108 = arith.addf %106, %107 : vector<8x32xf32>
    %109 = math.tanh %108 : vector<8x32xf32>
    %110 = arith.mulf %103, %109 : vector<8x32xf32>
    %c4_i32 = arith.constant 4 : i32
    %c8_i32_35 = arith.constant 8 : i32
    %111 = arith.muli %c4_i32, %c8_i32_35 : i32
    %112 = tpu.assume_multiple %111, 8 : i32
    %113 = arith.index_cast %112 : i32 to index
    %c0_36 = arith.constant 0 : index
    %114 = vector.load %arg8[%113, %c0_36] : memref<64x128xf32, #tpu.memory_space<vmem>>, vector<8x128xf32>
    %115 = arith.truncf %110 : vector<8x32xf32> to vector<8x32xbf16>
    %cst_37 = arith.constant dense<0.000000e+00> : vector<8x128xf32>
    %116 = tpu.matmul %115, %8, %cst_37 {dimension_numbers = #tpu.dot_dimension_numbers<[1], [0], [0], [1], [0, 0, 1, 1], [], []>} : vector<8x32xbf16>, vector<32x128xbf16>, vector<8x128xf32> -> vector<8x128xf32>
    %117 = arith.addf %114, %116 : vector<8x128xf32>
    %118 = vector.extract_strided_slice %117 {offsets = [0, 0], sizes = [8, 96], strides = [1, 1]} : vector<8x128xf32> to vector<8x96xf32>
    %cst_38 = arith.constant 5.000000e-01 : f32
    %119 = vector.broadcast %cst_38 : f32 to vector<8x96xf32>
    %120 = arith.mulf %119, %118 : vector<8x96xf32>
    %121 = math.tanh %120 : vector<8x96xf32>
    %cst_39 = arith.constant 5.000000e-01 : f32
    %122 = vector.broadcast %cst_39 : f32 to vector<8x96xf32>
    %123 = arith.mulf %122, %121 : vector<8x96xf32>
    %cst_40 = arith.constant 5.000000e-01 : f32
    %124 = vector.broadcast %cst_40 : f32 to vector<8x96xf32>
    %125 = arith.addf %123, %124 : vector<8x96xf32>
    %126 = vector.extract_strided_slice %125 {offsets = [0, 0], sizes = [8, 32], strides = [1, 1]} : vector<8x96xf32> to vector<8x32xf32>
    %127 = vector.extract_strided_slice %125 {offsets = [0, 32], sizes = [8, 32], strides = [1, 1]} : vector<8x96xf32> to vector<8x32xf32>
    %128 = vector.extract_strided_slice %125 {offsets = [0, 64], sizes = [8, 32], strides = [1, 1]} : vector<8x96xf32> to vector<8x32xf32>
    %129 = vector.extract_strided_slice %117 {offsets = [0, 96], sizes = [8, 32], strides = [1, 1]} : vector<8x128xf32> to vector<8x32xf32>
    %130 = math.tanh %129 : vector<8x32xf32>
    %131 = arith.mulf %127, %108 : vector<8x32xf32>
    %132 = arith.mulf %126, %130 : vector<8x32xf32>
    %133 = arith.addf %131, %132 : vector<8x32xf32>
    %134 = math.tanh %133 : vector<8x32xf32>
    %135 = arith.mulf %128, %134 : vector<8x32xf32>
    %c5_i32 = arith.constant 5 : i32
    %c8_i32_41 = arith.constant 8 : i32
    %136 = arith.muli %c5_i32, %c8_i32_41 : i32
    %137 = tpu.assume_multiple %136, 8 : i32
    %138 = arith.index_cast %137 : i32 to index
    %c0_42 = arith.constant 0 : index
    %139 = vector.load %arg8[%138, %c0_42] : memref<64x128xf32, #tpu.memory_space<vmem>>, vector<8x128xf32>
    %140 = arith.truncf %135 : vector<8x32xf32> to vector<8x32xbf16>
    %cst_43 = arith.constant dense<0.000000e+00> : vector<8x128xf32>
    %141 = tpu.matmul %140, %8, %cst_43 {dimension_numbers = #tpu.dot_dimension_numbers<[1], [0], [0], [1], [0, 0, 1, 1], [], []>} : vector<8x32xbf16>, vector<32x128xbf16>, vector<8x128xf32> -> vector<8x128xf32>
    %142 = arith.addf %139, %141 : vector<8x128xf32>
    %143 = vector.extract_strided_slice %142 {offsets = [0, 0], sizes = [8, 96], strides = [1, 1]} : vector<8x128xf32> to vector<8x96xf32>
    %cst_44 = arith.constant 5.000000e-01 : f32
    %144 = vector.broadcast %cst_44 : f32 to vector<8x96xf32>
    %145 = arith.mulf %144, %143 : vector<8x96xf32>
    %146 = math.tanh %145 : vector<8x96xf32>
    %cst_45 = arith.constant 5.000000e-01 : f32
    %147 = vector.broadcast %cst_45 : f32 to vector<8x96xf32>
    %148 = arith.mulf %147, %146 : vector<8x96xf32>
    %cst_46 = arith.constant 5.000000e-01 : f32
    %149 = vector.broadcast %cst_46 : f32 to vector<8x96xf32>
    %150 = arith.addf %148, %149 : vector<8x96xf32>
    %151 = vector.extract_strided_slice %150 {offsets = [0, 0], sizes = [8, 32], strides = [1, 1]} : vector<8x96xf32> to vector<8x32xf32>
    %152 = vector.extract_strided_slice %150 {offsets = [0, 32], sizes = [8, 32], strides = [1, 1]} : vector<8x96xf32> to vector<8x32xf32>
    %153 = vector.extract_strided_slice %150 {offsets = [0, 64], sizes = [8, 32], strides = [1, 1]} : vector<8x96xf32> to vector<8x32xf32>
    %154 = vector.extract_strided_slice %142 {offsets = [0, 96], sizes = [8, 32], strides = [1, 1]} : vector<8x128xf32> to vector<8x32xf32>
    %155 = math.tanh %154 : vector<8x32xf32>
    %156 = arith.mulf %152, %133 : vector<8x32xf32>
    %157 = arith.mulf %151, %155 : vector<8x32xf32>
    %158 = arith.addf %156, %157 : vector<8x32xf32>
    %159 = math.tanh %158 : vector<8x32xf32>
    %160 = arith.mulf %153, %159 : vector<8x32xf32>
    %c6_i32 = arith.constant 6 : i32
    %c8_i32_47 = arith.constant 8 : i32
    %161 = arith.muli %c6_i32, %c8_i32_47 : i32
    %162 = tpu.assume_multiple %161, 8 : i32
    %163 = arith.index_cast %162 : i32 to index
    %c0_48 = arith.constant 0 : index
    %164 = vector.load %arg8[%163, %c0_48] : memref<64x128xf32, #tpu.memory_space<vmem>>, vector<8x128xf32>
    %165 = arith.truncf %160 : vector<8x32xf32> to vector<8x32xbf16>
    %cst_49 = arith.constant dense<0.000000e+00> : vector<8x128xf32>
    %166 = tpu.matmul %165, %8, %cst_49 {dimension_numbers = #tpu.dot_dimension_numbers<[1], [0], [0], [1], [0, 0, 1, 1], [], []>} : vector<8x32xbf16>, vector<32x128xbf16>, vector<8x128xf32> -> vector<8x128xf32>
    %167 = arith.addf %164, %166 : vector<8x128xf32>
    %168 = vector.extract_strided_slice %167 {offsets = [0, 0], sizes = [8, 96], strides = [1, 1]} : vector<8x128xf32> to vector<8x96xf32>
    %cst_50 = arith.constant 5.000000e-01 : f32
    %169 = vector.broadcast %cst_50 : f32 to vector<8x96xf32>
    %170 = arith.mulf %169, %168 : vector<8x96xf32>
    %171 = math.tanh %170 : vector<8x96xf32>
    %cst_51 = arith.constant 5.000000e-01 : f32
    %172 = vector.broadcast %cst_51 : f32 to vector<8x96xf32>
    %173 = arith.mulf %172, %171 : vector<8x96xf32>
    %cst_52 = arith.constant 5.000000e-01 : f32
    %174 = vector.broadcast %cst_52 : f32 to vector<8x96xf32>
    %175 = arith.addf %173, %174 : vector<8x96xf32>
    %176 = vector.extract_strided_slice %175 {offsets = [0, 0], sizes = [8, 32], strides = [1, 1]} : vector<8x96xf32> to vector<8x32xf32>
    %177 = vector.extract_strided_slice %175 {offsets = [0, 32], sizes = [8, 32], strides = [1, 1]} : vector<8x96xf32> to vector<8x32xf32>
    %178 = vector.extract_strided_slice %175 {offsets = [0, 64], sizes = [8, 32], strides = [1, 1]} : vector<8x96xf32> to vector<8x32xf32>
    %179 = vector.extract_strided_slice %167 {offsets = [0, 96], sizes = [8, 32], strides = [1, 1]} : vector<8x128xf32> to vector<8x32xf32>
    %180 = math.tanh %179 : vector<8x32xf32>
    %181 = arith.mulf %177, %158 : vector<8x32xf32>
    %182 = arith.mulf %176, %180 : vector<8x32xf32>
    %183 = arith.addf %181, %182 : vector<8x32xf32>
    %184 = math.tanh %183 : vector<8x32xf32>
    %185 = arith.mulf %178, %184 : vector<8x32xf32>
    %c7_i32 = arith.constant 7 : i32
    %c8_i32_53 = arith.constant 8 : i32
    %186 = arith.muli %c7_i32, %c8_i32_53 : i32
    %187 = tpu.assume_multiple %186, 8 : i32
    %188 = arith.index_cast %187 : i32 to index
    %c0_54 = arith.constant 0 : index
    %189 = vector.load %arg8[%188, %c0_54] : memref<64x128xf32, #tpu.memory_space<vmem>>, vector<8x128xf32>
    %190 = arith.truncf %185 : vector<8x32xf32> to vector<8x32xbf16>
    %cst_55 = arith.constant dense<0.000000e+00> : vector<8x128xf32>
    %191 = tpu.matmul %190, %8, %cst_55 {dimension_numbers = #tpu.dot_dimension_numbers<[1], [0], [0], [1], [0, 0, 1, 1], [], []>} : vector<8x32xbf16>, vector<32x128xbf16>, vector<8x128xf32> -> vector<8x128xf32>
    %192 = arith.addf %189, %191 : vector<8x128xf32>
    %193 = vector.extract_strided_slice %192 {offsets = [0, 0], sizes = [8, 96], strides = [1, 1]} : vector<8x128xf32> to vector<8x96xf32>
    %cst_56 = arith.constant 5.000000e-01 : f32
    %194 = vector.broadcast %cst_56 : f32 to vector<8x96xf32>
    %195 = arith.mulf %194, %193 : vector<8x96xf32>
    %196 = math.tanh %195 : vector<8x96xf32>
    %cst_57 = arith.constant 5.000000e-01 : f32
    %197 = vector.broadcast %cst_57 : f32 to vector<8x96xf32>
    %198 = arith.mulf %197, %196 : vector<8x96xf32>
    %cst_58 = arith.constant 5.000000e-01 : f32
    %199 = vector.broadcast %cst_58 : f32 to vector<8x96xf32>
    %200 = arith.addf %198, %199 : vector<8x96xf32>
    %201 = vector.extract_strided_slice %200 {offsets = [0, 0], sizes = [8, 32], strides = [1, 1]} : vector<8x96xf32> to vector<8x32xf32>
    %202 = vector.extract_strided_slice %200 {offsets = [0, 32], sizes = [8, 32], strides = [1, 1]} : vector<8x96xf32> to vector<8x32xf32>
    %203 = vector.extract_strided_slice %200 {offsets = [0, 64], sizes = [8, 32], strides = [1, 1]} : vector<8x96xf32> to vector<8x32xf32>
    %204 = vector.extract_strided_slice %192 {offsets = [0, 96], sizes = [8, 32], strides = [1, 1]} : vector<8x128xf32> to vector<8x32xf32>
    %205 = math.tanh %204 : vector<8x32xf32>
    %206 = arith.mulf %202, %183 : vector<8x32xf32>
    %207 = arith.mulf %201, %205 : vector<8x32xf32>
    %208 = arith.addf %206, %207 : vector<8x32xf32>
    %209 = math.tanh %208 : vector<8x32xf32>
    %210 = arith.mulf %203, %209 : vector<8x32xf32>
    %c8_i32_59 = arith.constant 8 : i32
    %c0_60 = arith.constant 0 : index
    %c0_61 = arith.constant 0 : index
    %211 = vector.load %arg5[%c0_60, %c0_61] : memref<1x32xf32, #tpu.memory_space<vmem>>, vector<1x32xf32>
    %212 = vector.broadcast %211 : vector<1x32xf32> to vector<8x32xf32>
    %213 = arith.mulf %210, %212 : vector<8x32xf32>
    %cst_62 = arith.constant dense<0.000000e+00> : vector<8xf32>
    %214 = vector.multi_reduction <add>, %213, %cst_62 [1] : vector<8x32xf32> to vector<8xf32>
    %215 = vector.shape_cast %214 : vector<8xf32> to vector<8x1xf32>
    %c0_63 = arith.constant 0 : index
    %c0_64 = arith.constant 0 : index
    %216 = vector.load %arg6[%c0_63, %c0_64] : memref<1x1xf32, #tpu.memory_space<vmem>>, vector<1x1xf32>
    %217 = vector.broadcast %216 : vector<1x1xf32> to vector<8x1xf32>
    %218 = arith.addf %215, %217 : vector<8x1xf32>
    %c0_65 = arith.constant 0 : index
    %c0_66 = arith.constant 0 : index
    %c0_67 = arith.constant 0 : index
    %219 = vector.load %arg7[%c0_65, %c0_66, %c0_67] : memref<1x8x1xf32, #tpu.memory_space<vmem>>, vector<1x8x1xf32>
    %220 = vector.shape_cast %219 : vector<1x8x1xf32> to vector<8x1xf32>
    %221 = vector.shape_cast %218 : vector<8x1xf32> to vector<1x8x1xf32>
    tpu.vector_store %arg7[%c0_65, %c0_66, %c0_67], %221 {strides = array<i32>} : memref<1x8x1xf32, #tpu.memory_space<vmem>>, vector<1x8x1xf32>,
    return
  }
  func.func @transform_0(%arg0: i32) -> (i32, i32, i32) {
    %c0_i32 = arith.constant 0 : i32
    %c0_i32_0 = arith.constant 0 : i32
    %c0_i32_1 = arith.constant 0 : i32
    return %arg0, %c0_i32, %c0_i32_0 : i32, i32, i32
  }
  func.func @transform_1(%arg0: i32) -> (i32, i32) {
    %c0_i32 = arith.constant 0 : i32
    %c0_i32_0 = arith.constant 0 : i32
    %c0_i32_1 = arith.constant 0 : i32
    return %c0_i32, %c0_i32_0 : i32, i32
  }
  func.func @transform_2(%arg0: i32) -> (i32, i32) {
    %c0_i32 = arith.constant 0 : i32
    %c0_i32_0 = arith.constant 0 : i32
    %c0_i32_1 = arith.constant 0 : i32
    return %c0_i32, %c0_i32_0 : i32, i32
  }
  func.func @transform_3(%arg0: i32) -> (i32, i32) {
    %c0_i32 = arith.constant 0 : i32
    %c0_i32_0 = arith.constant 0 : i32
    %c0_i32_1 = arith.constant 0 : i32
    return %c0_i32, %c0_i32_0 : i32, i32
  }
  func.func @transform_4(%arg0: i32) -> (i32, i32) {
    %c0_i32 = arith.constant 0 : i32
    %c0_i32_0 = arith.constant 0 : i32
    %c0_i32_1 = arith.constant 0 : i32
    return %c0_i32, %c0_i32_0 : i32, i32
  }
  func.func @transform_5(%arg0: i32) -> (i32, i32) {
    %c0_i32 = arith.constant 0 : i32
    %c0_i32_0 = arith.constant 0 : i32
    %c0_i32_1 = arith.constant 0 : i32
    return %c0_i32, %c0_i32_0 : i32, i32
  }
  func.func @transform_6(%arg0: i32) -> (i32, i32, i32) {
    %c0_i32 = arith.constant 0 : i32
    %c0_i32_0 = arith.constant 0 : i32
    %c0_i32_1 = arith.constant 0 : i32
    return %arg0, %c0_i32, %c0_i32_0 : i32, i32, i32
  }
}

</mosaic_0001>

<bundles_post_ra>
// kernel: lstm_forward.1
= control target key start
LH: loop header
LB: loop body
LE: loop exit
PB: predicated region body
PF: predicated region fallthrough
CT: control target
= control target key end

     0   :  { %s949_s23 = smov 0   ;;  %s1046_s0 = inlined_call_operand.vmem [shape: bf16[2,64,4], index: 0, kind: input, shape index: {}]   ;;  %s1047_s1 = inlined_call_operand.vmem [shape: bf16[4,128], index: 1, kind: input, shape index: {}]   ;;  %s1048_s2 = inlined_call_operand.vmem [shape: bf16[32,128], index: 2, kind: input, shape index: {}]   ;;  %s1049_s3 = inlined_call_operand.vmem [shape: f32[1,128], index: 3, kind: input, shape index: {}]   ;;  %s1050_s4 = inlined_call_operand.vmem [shape: f32[1,32], index: 4, kind: input, shape index: {}]   ;;  %s1051_s5 = inlined_call_operand.<no memory space> [shape: f32[1,1], index: 5, kind: input, shape index: {}]   ;;  %s1052_s6 = inlined_call_operand.vmem [shape: f32[2,8,1], index: 6, kind: output, shape index: {}]  }
   0x1   :  { %v11_v0 = vstv %s1051_s5 }
   0x2   :  { %12 = vst [vmem:[#allocation3] sm:$0x1] %v11_v0 }
   0x3 LB: > { %s786_s24 = sadd.s32 4294967295, %s906_s23   ;;  %p790_p0 = scmp.ge.s32.totalorder %s906_s23, 1  ;;  %s906_s23 = sphi %s949_s23, %s18_s23  }
   0x4   : > { %p214_p1 = scmp.lt.s32.totalorder %s906_s23, 3 }
   0x6   : > { %p215_p2 = pnand %p790_p0, %p214_p1 }
   0x7   : > { %p243_p3 = scmp.lt.s32.totalorder (!%p215_p2), %s786_s24, 1  ;;  %s909_s12 = smov (!%p215_p2), 32  }
   0x8   : > { %218 = sbr.rel (%p215_p2) target bundleno = 4787 (0x12b3), region = 44  ;;  %s910_s13 = smov (!%p215_p2), 64  }
   0xd   : > { %v837_v1 = vld [vmem:[%s1048_s2 + $0x8] sm:$0xff]  ;;  %v261_v2 = vld [vmem:[%s1047_s1] sm:$0x3]  ;;  %vm299_vm0 = vcmask 1041408   ;;  %s1054_s24 = smov (!%p243_p3, %s786_s24), 1  ;;  %vm286_vm1 = vcmask 31744  }
   0xe   : > { %v301_v3 = vsel %vm299_vm0, %v261_v2, 0  ;;  %367 = vmatpush.bf16.msra.mxu1 %v837_v1  ;;  %v836_v4 = vld [vmem:[%s1048_s2] sm:$0xff]  ;;  %412 = vmatpush.bf16.msra.mxu2 %v837_v1  ;;  %s831_s30 = sshll.u32 %s1054_s24, 5  ;;  %v908_v6 = vmov 0   ;;  %vm357_vm2 = vcmask 261120   ;;  %s793_s16 = sshll.u32 %s1054_s24, 3 }
   0xf   : > { %310 = vmatpush.bf16.msra.mxu0 %v301_v3  ;;  %457 = vmatpush.bf16.msra.mxu3 %v837_v1  ;;  %s972_s9 = scalar_lea.vmem %s1046_s0, %s831_s30  ;;  %v979_v7 = vld [vmem:[%s1049_s3] ss:$0 sm:$0xff]  ;;  %s251_s19 = scalar_lea.vmem %s1052_s6, %s793_s16  ;;  %vm731_vm3 = vcmask 7168  }
  0x10   : > { %v832_v5 = vld [vmem:[%s972_s9] sm:$0xff]  ;;  %v833_v44 = vld [vmem:[%s972_s9 + $0x8] sm:$0xff] }
  0x12   : > { %368 = vmatpush.bf16.msra.mxu1 %v836_v4  ;;  %413 = vmatpush.bf16.msra.mxu2 %v836_v4 }
  0x13   : > { %458 = vmatpush.bf16.msra.mxu3 %v836_v4  ;;  %810 = vmatmul.msk.bf16.vlgmr.msra.gmra.mxu0 %vm286_vm1, %v832_v5 }
  0x15   : > { %369 = vmatmul.bf16.vlgmr.msra.gmra.mxu1 %v908_v6 }
  0x16   : > { %502 = vmatpush.bf16.msrb.mxu1 %v837_v1  ;;  %547 = vmatpush.bf16.msrb.mxu2 %v837_v1 }
  0x17   : > { %592 = vmatpush.bf16.msrb.mxu3 %v837_v1 }
  0x1a   : > { %503 = vmatpush.bf16.msrb.mxu1 %v836_v4  ;;  %548 = vmatpush.bf16.msrb.mxu2 %v836_v4 }
  0x1b   : > { %593 = vmatpush.bf16.msrb.mxu3 %v836_v4 }
  0x1e   : > { %637 = vmatpush.bf16.msra.mxu1 %v837_v1 }
  0x22   : > { %638 = vmatpush.bf16.msra.mxu1 %v836_v4 }
  0x23   : > { %811 = vmatmul.msk.bf16.gmra.mxu0 %vm286_vm1, %v833_v44 }
  0x90   : > { %v312_v8 = vpop.f32.mrf.mxu0 }
  0x91   : > { %v313_v9 = vadd.f32 %v979_v7, %v312_v8 }
  0x92   : > { %v370_v10 = vpop.f32.mrf.mxu1 }
  0x93   : > { %v374_v11 = vadd.f32 %v370_v10, %v313_v9 }
  0x95   : > { %852 = vtanh.f32 %v374_v11  ;;  %v375_v14 = vmul.f32 0.5, %v374_v11 }
  0x97   : > { %854 = vtanh.f32 %v375_v14 }
  0x98   : > { %v314_v28 = vpop.f32.mrf.mxu0 }
  0x99   : > { %v315_v29 = vadd.f32 %v979_v7, %v314_v28 }
  0x9a   : > { %v372_v12 = vpop.f32.mrf.mxu1 }
  0x9b   : > { %v853_v13 = vpop.eup %852 }
  0x9c   : > { %382 = vrot.lane.b32.xlu0 %v853_v13, %s909_s12 }
  0x9d   : > { %v855_v15 = vpop.eup %854 }
  0x9e   : > { %v377_v16 = vmul.f32 0.5, %v855_v15 }
  0xa0   : > { %v378_v17 = vadd.f32 0.5, %v377_v16  ;;  %v317_v49 = vpop.f32.mrf.mxu0 }
  0xa1   : > { %v318_v50 = vadd.f32 %v979_v7, %v317_v49 }
  0xa2   : > { %v380_v20 = vmul.f32 0.0, %v378_v17 }
  0xa8   : > { %v319_v5 = vpop.f32.mrf.mxu0 }
  0xa9   : > { %v320_v6 = vadd.f32 %v979_v7, %v319_v5 }
 0x10e   : > { %v383_v18 = vpop.permute.xlu0 %382 }
 0x10f   : > { %v385_v19 = vmul.f32 %v383_v18, %v378_v17 }
 0x111   : > { %387 = vrot.lane.b32.xlu0 %v385_v19, %s909_s12 }
 0x183   : > { %v388_v21 = vpop.permute.xlu0 %387 }
 0x184   : > { %v390_v22 = vadd.f32 %v388_v21, %v380_v20 }
 0x186   : > { %856 = vtanh.f32 %v390_v22 }
 0x18c   : > { %v857_v23 = vpop.eup %856 }
 0x18d   : > { %393 = vrot.lane.b32.xlu1 %v857_v23, %s909_s12 }
 0x1ff   : > { %v394_v24 = vpop.permute.xlu1 %393 }
 0x200   : > { %v396_v25 = vmul.f32 %v394_v24, %v378_v17 }
 0x202   : > { %v399_v26 = vpack.c.bf16 %v396_v25, %v396_v25 }
 0x204   : > { %401 = vrot.lane.b32.xlu1 %v399_v26, %s910_s13 }
 0x276   : > { %v402_v27 = vpop.permute.xlu1 %401 }
 0x277   : > { %822 = vmatmul.msk.bf16.vlgmr.msra.gmra.mxu2 %vm357_vm2, %v402_v27 }
 0x278   : > { %682 = vmatpush.bf16.msra.mxu2 %v837_v1 }
 0x27c   : > { %683 = vmatpush.bf16.msra.mxu2 %v836_v4 }
 0x2fa   : > { %v415_v30 = vpop.f32.mrf.mxu2 }
 0x2fb   : > { %v419_v31 = vadd.f32 %v415_v30, %v315_v29 }
 0x2fd   : > { %858 = vtanh.f32 %v419_v31  ;;  %v420_v34 = vmul.f32 0.5, %v419_v31 }
 0x2ff   : > { %860 = vtanh.f32 %v420_v34 }
 0x302   : > { %v417_v32 = vpop.f32.mrf.mxu2 }
 0x303   : > { %v859_v33 = vpop.eup %858 }
 0x304   : > { %427 = vrot.lane.b32.xlu2 %v859_v33, %s909_s12 }
 0x305   : > { %v861_v35 = vpop.eup %860 }
 0x306   : > { %v422_v36 = vmul.f32 0.5, %v861_v35 }
 0x308   : > { %v423_v37 = vadd.f32 0.5, %v422_v36 }
 0x30a   : > { %v425_v40 = vmul.f32 %v423_v37, %v390_v22  ;;  %v834_v22 = vld [vmem:[%s972_s9 + $0x10] sm:$0xff] }
 0x30b   : > { %812 = vmatmul.msk.bf16.gmra.mxu0 %vm286_vm1, %v834_v22 }
 0x35e   : > { %v428_v38 = vpop.permute.xlu2 %427 }
 0x35f   : > { %v430_v39 = vmul.f32 %v428_v38, %v423_v37 }
 0x361   : > { %432 = vrot.lane.b32.xlu2 %v430_v39, %s909_s12 }
 0x388   : > { %v322_v27 = vpop.f32.mrf.mxu0 }
 0x389   : > { %v323_v28 = vadd.f32 %v979_v7, %v322_v27 }
 0x3bb   : > { %v433_v41 = vpop.permute.xlu2 %432 }
 0x3bc   : > { %v435_v42 = vadd.f32 %v433_v41, %v425_v40 }
 0x3be   : > { %862 = vtanh.f32 %v435_v42 }
 0x3c4   : > { %v863_v43 = vpop.eup %862 }
 0x3c5   : > { %438 = vrot.lane.b32.xlu0 %v863_v43, %s909_s12 }
 0x437   : > { %v439_v45 = vpop.permute.xlu0 %438 }
 0x438   : > { %v441_v46 = vmul.f32 %v439_v45, %v423_v37 }
 0x43a   : > { %v444_v47 = vpack.c.bf16 %v441_v46, %v441_v46 }
 0x43c   : > { %446 = vrot.lane.b32.xlu1 %v444_v47, %s910_s13  ;;  %v324_v47 = vpop.f32.mrf.mxu0 }
 0x4ae   : > { %v447_v48 = vpop.permute.xlu1 %446 }
 0x4af   : > { %823 = vmatmul.msk.bf16.vlgmr.msra.gmra.mxu3 %vm357_vm2, %v447_v48  ;;  %v325_v48 = vadd.f32 %v979_v7, %v324_v47  ;;  %v851_v47 = vld [vmem:[#allocation3] ss:$0 sm:$0xff] }
 0x532   : > { %v460_v51 = vpop.f32.mrf.mxu3 }
 0x533   : > { %v464_v52 = vadd.f32 %v460_v51, %v318_v50 }
 0x535   : > { %864 = vtanh.f32 %v464_v52  ;;  %v465_v55 = vmul.f32 0.5, %v464_v52 }
 0x537   : > { %866 = vtanh.f32 %v465_v55 }
 0x53a   : > { %v462_v53 = vpop.f32.mrf.mxu3 }
 0x53b   : > { %v865_v54 = vpop.eup %864 }
 0x53c   : > { %472 = vrot.lane.b32.xlu2 %v865_v54, %s909_s12 }
 0x53d   : > { %v867_v56 = vpop.eup %866 }
 0x53e   : > { %v467_v57 = vmul.f32 0.5, %v867_v56 }
 0x540   : > { %v468_v58 = vadd.f32 0.5, %v467_v57 }
 0x542   : > { %v470_v61 = vmul.f32 %v468_v58, %v435_v42 }
 0x596   : > { %v473_v59 = vpop.permute.xlu2 %472 }
 0x597   : > { %v475_v60 = vmul.f32 %v473_v59, %v468_v58 }
 0x599   : > { %477 = vrot.lane.b32.xlu0 %v475_v60, %s909_s12 }
 0x60b   : > { %v478_v62 = vpop.permute.xlu0 %477 }
 0x60c   : > { %v480_v63 = vadd.f32 %v478_v62, %v470_v61 }
 0x60e   : > { %868 = vtanh.f32 %v480_v63 }
 0x614   : > { %v869_v0 = vpop.eup %868 }
 0x615   : > { %483 = vrot.lane.b32.xlu1 %v869_v0, %s909_s12 }
 0x687   : > { %v484_v1 = vpop.permute.xlu1 %483 }
 0x688   : > { %v486_v2 = vmul.f32 %v484_v1, %v468_v58 }
 0x68a   : > { %v489_v3 = vpack.c.bf16 %v486_v2, %v486_v2 }
 0x68c   : > { %491 = vrot.lane.b32.xlu2 %v489_v3, %s910_s13 }
 0x6e6   : > { %v492_v4 = vpop.permute.xlu2 %491 }
 0x6e7   : > { %824 = vmatmul.msk.bf16.vlgmr.msrb.gmra.mxu1 %vm357_vm2, %v492_v4 }
 0x764   : > { %v505_v8 = vpop.f32.mrf.mxu1 }
 0x765   : > { %v509_v9 = vadd.f32 %v505_v8, %v320_v6 }
 0x767   : > { %870 = vtanh.f32 %v509_v9  ;;  %v510_v12 = vmul.f32 0.5, %v509_v9 }
 0x769   : > { %872 = vtanh.f32 %v510_v12 }
 0x76c   : > { %v507_v10 = vpop.f32.mrf.mxu1 }
 0x76d   : > { %v871_v11 = vpop.eup %870 }
 0x76e   : > { %517 = vrot.lane.b32.xlu0 %v871_v11, %s909_s12 }
 0x76f   : > { %v873_v13 = vpop.eup %872 }
 0x770   : > { %v512_v14 = vmul.f32 0.5, %v873_v13 }
 0x772   : > { %v513_v15 = vadd.f32 0.5, %v512_v14 }
 0x774   : > { %v515_v18 = vmul.f32 %v513_v15, %v480_v63  ;;  %v835_v63 = vld [vmem:[%s972_s9 + $0x18] sm:$0xff] }
 0x775   : > { %813 = vmatmul.msk.bf16.gmra.mxu0 %vm286_vm1, %v835_v63 }
 0x7e0   : > { %v518_v16 = vpop.permute.xlu0 %517 }
 0x7e1   : > { %v520_v17 = vmul.f32 %v518_v16, %v513_v15 }
 0x7e3   : > { %522 = vrot.lane.b32.xlu1 %v520_v17, %s909_s12 }
 0x7f2   : > { %v327_v4 = vpop.f32.mrf.mxu0 }
 0x7f3   : > { %v328_v5 = vadd.f32 %v979_v7, %v327_v4 }
 0x855   : > { %v523_v19 = vpop.permute.xlu1 %522 }
 0x856   : > { %v525_v20 = vadd.f32 %v523_v19, %v515_v18 }
 0x858   : > { %874 = vtanh.f32 %v525_v20 }
 0x85e   : > { %v875_v21 = vpop.eup %874 }
 0x85f   : > { %528 = vrot.lane.b32.xlu2 %v875_v21, %s909_s12 }
 0x8b9   : > { %v529_v23 = vpop.permute.xlu2 %528 }
 0x8ba   : > { %v531_v24 = vmul.f32 %v529_v23, %v513_v15 }
 0x8bc   : > { %v534_v25 = vpack.c.bf16 %v531_v24, %v531_v24 }
 0x8be   : > { %536 = vrot.lane.b32.xlu0 %v534_v25, %s910_s13  ;;  %v329_v25 = vpop.f32.mrf.mxu0 }
 0x930   : > { %v537_v26 = vpop.permute.xlu0 %536 }
 0x931   : > { %825 = vmatmul.msk.bf16.vlgmr.msrb.gmra.mxu2 %vm357_vm2, %v537_v26  ;;  %v330_v26 = vadd.f32 %v979_v7, %v329_v25  ;;  %v850_v7 = vld [vmem:[%s1050_s4] ss:$0 sm:$0xff] }
 0x9b4   : > { %v550_v29 = vpop.f32.mrf.mxu2 }
 0x9b5   : > { %v554_v30 = vadd.f32 %v550_v29, %v323_v28 }
 0x9b7   : > { %876 = vtanh.f32 %v554_v30  ;;  %v555_v33 = vmul.f32 0.5, %v554_v30 }
 0x9b9   : > { %878 = vtanh.f32 %v555_v33 }
 0x9bc   : > { %v552_v31 = vpop.f32.mrf.mxu2 }
 0x9bd   : > { %v877_v32 = vpop.eup %876 }
 0x9be   : > { %562 = vrot.lane.b32.xlu1 %v877_v32, %s909_s12 }
 0x9bf   : > { %v879_v34 = vpop.eup %878 }
 0x9c0   : > { %v557_v35 = vmul.f32 0.5, %v879_v34 }
 0x9c2   : > { %v558_v36 = vadd.f32 0.5, %v557_v35 }
 0x9c4   : > { %v560_v39 = vmul.f32 %v558_v36, %v525_v20 }
 0xa30   : > { %v563_v37 = vpop.permute.xlu1 %562 }
 0xa31   : > { %v565_v38 = vmul.f32 %v563_v37, %v558_v36 }
 0xa33   : > { %567 = vrot.lane.b32.xlu2 %v565_v38, %s909_s12 }
 0xa8d   : > { %v568_v40 = vpop.permute.xlu2 %567 }
 0xa8e   : > { %v570_v41 = vadd.f32 %v568_v40, %v560_v39 }
 0xa90   : > { %880 = vtanh.f32 %v570_v41 }
 0xa96   : > { %v881_v42 = vpop.eup %880 }
 0xa97   : > { %573 = vrot.lane.b32.xlu0 %v881_v42, %s909_s12 }
 0xb09   : > { %v574_v43 = vpop.permute.xlu0 %573 }
 0xb0a   : > { %v576_v44 = vmul.f32 %v574_v43, %v558_v36 }
 0xb0c   : > { %v579_v45 = vpack.c.bf16 %v576_v44, %v576_v44 }
 0xb0e   : > { %581 = vrot.lane.b32.xlu1 %v579_v45, %s910_s13 }
 0xb80   : > { %v582_v46 = vpop.permute.xlu1 %581 }
 0xb81   : > { %826 = vmatmul.msk.bf16.vlgmr.msrb.gmra.mxu3 %vm357_vm2, %v582_v46 }
 0xc04   : > { %v595_v49 = vpop.f32.mrf.mxu3 }
 0xc05   : > { %v599_v50 = vadd.f32 %v595_v49, %v325_v48 }
 0xc07   : > { %882 = vtanh.f32 %v599_v50  ;;  %v600_v53 = vmul.f32 0.5, %v599_v50 }
 0xc09   : > { %884 = vtanh.f32 %v600_v53 }
 0xc0c   : > { %v597_v51 = vpop.f32.mrf.mxu3 }
 0xc0d   : > { %v883_v52 = vpop.eup %882 }
 0xc0e   : > { %607 = vrot.lane.b32.xlu2 %v883_v52, %s909_s12 }
 0xc0f   : > { %v885_v54 = vpop.eup %884 }
 0xc10   : > { %v602_v55 = vmul.f32 0.5, %v885_v54 }
 0xc12   : > { %v603_v56 = vadd.f32 0.5, %v602_v55 }
 0xc14   : > { %v605_v59 = vmul.f32 %v603_v56, %v570_v41 }
 0xc68   : > { %v608_v57 = vpop.permute.xlu2 %607 }
 0xc69   : > { %v610_v58 = vmul.f32 %v608_v57, %v603_v56 }
 0xc6b   : > { %612 = vrot.lane.b32.xlu0 %v610_v58, %s909_s12 }
 0xcdd   : > { %v613_v60 = vpop.permute.xlu0 %612 }
 0xcde   : > { %v615_v61 = vadd.f32 %v613_v60, %v605_v59 }
 0xce0   : > { %886 = vtanh.f32 %v615_v61 }
 0xce6   : > { %v887_v62 = vpop.eup %886 }
 0xce7   : > { %618 = vrot.lane.b32.xlu1 %v887_v62, %s909_s12 }
 0xd59   : > { %v619_v0 = vpop.permute.xlu1 %618 }
 0xd5a   : > { %v621_v1 = vmul.f32 %v619_v0, %v603_v56 }
 0xd5c   : > { %v624_v2 = vpack.c.bf16 %v621_v1, %v621_v1 }
 0xd5e   : > { %626 = vrot.lane.b32.xlu2 %v624_v2, %s910_s13 }
 0xdb8   : > { %v627_v3 = vpop.permute.xlu2 %626 }
 0xdb9   : > { %827 = vmatmul.msk.bf16.vlgmr.msra.gmra.mxu1 %vm357_vm2, %v627_v3 }
 0xe36   : > { %v640_v6 = vpop.f32.mrf.mxu1 }
 0xe37   : > { %v644_v8 = vadd.f32 %v640_v6, %v328_v5 }
 0xe39   : > { %888 = vtanh.f32 %v644_v8  ;;  %v645_v11 = vmul.f32 0.5, %v644_v8 }
 0xe3b   : > { %890 = vtanh.f32 %v645_v11 }
 0xe3e   : > { %v642_v9 = vpop.f32.mrf.mxu1 }
 0xe3f   : > { %v889_v10 = vpop.eup %888 }
 0xe40   : > { %652 = vrot.lane.b32.xlu0 %v889_v10, %s909_s12 }
 0xe41   : > { %v891_v12 = vpop.eup %890 }
 0xe42   : > { %v647_v13 = vmul.f32 0.5, %v891_v12 }
 0xe44   : > { %v648_v14 = vadd.f32 0.5, %v647_v13 }
 0xe46   : > { %v650_v17 = vmul.f32 %v648_v14, %v615_v61 }
 0xeb2   : > { %v653_v15 = vpop.permute.xlu0 %652 }
 0xeb3   : > { %v655_v16 = vmul.f32 %v653_v15, %v648_v14 }
 0xeb5   : > { %657 = vrot.lane.b32.xlu1 %v655_v16, %s909_s12 }
 0xf27   : > { %v658_v18 = vpop.permute.xlu1 %657 }
 0xf28   : > { %v660_v19 = vadd.f32 %v658_v18, %v650_v17 }
 0xf2a   : > { %892 = vtanh.f32 %v660_v19 }
 0xf30   : > { %v893_v20 = vpop.eup %892 }
 0xf31   : > { %663 = vrot.lane.b32.xlu2 %v893_v20, %s909_s12 }
 0xf8b   : > { %v664_v21 = vpop.permute.xlu2 %663 }
 0xf8c   : > { %v666_v22 = vmul.f32 %v664_v21, %v648_v14 }
 0xf8e   : > { %v669_v23 = vpack.c.bf16 %v666_v22, %v666_v22 }
 0xf90   : > { %671 = vrot.lane.b32.xlu0 %v669_v23, %s910_s13 }
0x1002   : > { %v672_v24 = vpop.permute.xlu0 %671 }
0x1003   : > { %828 = vmatmul.msk.bf16.vlgmr.msra.gmra.mxu2 %vm357_vm2, %v672_v24 }
0x1086   : > { %v685_v27 = vpop.f32.mrf.mxu2 }
0x1087   : > { %v689_v28 = vadd.f32 %v685_v27, %v330_v26 }
0x1089   : > { %894 = vtanh.f32 %v689_v28  ;;  %v690_v31 = vmul.f32 0.5, %v689_v28 }
0x108b   : > { %896 = vtanh.f32 %v690_v31 }
0x108e   : > { %v687_v29 = vpop.f32.mrf.mxu2 }
0x108f   : > { %v895_v30 = vpop.eup %894 }
0x1090   : > { %697 = vrot.lane.b32.xlu1 %v895_v30, %s909_s12 }
0x1091   : > { %v897_v32 = vpop.eup %896 }
0x1092   : > { %v692_v33 = vmul.f32 0.5, %v897_v32 }
0x1094   : > { %v693_v34 = vadd.f32 0.5, %v692_v33 }
0x1096   : > { %v695_v37 = vmul.f32 %v693_v34, %v660_v19 }
0x1098   : > { %715 = vrot.lane.b32.xlu1 %v850_v7, %s910_s13 }
0x1102   : > { %v698_v35 = vpop.permute.xlu1 %697 }
0x1103   : > { %v700_v36 = vmul.f32 %v698_v35, %v693_v34 }
0x1105   : > { %702 = vrot.lane.b32.xlu2 %v700_v36, %s909_s12 }
0x110a   : > { %v716_v42 = vpop.permute.xlu1 %715 }
0x115f   : > { %v703_v38 = vpop.permute.xlu2 %702 }
0x1160   : > { %v705_v39 = vadd.f32 %v703_v38, %v695_v37 }
0x1162   : > { %898 = vtanh.f32 %v705_v39 }
0x1168   : > { %v899_v40 = vpop.eup %898 }
0x1169   : > { %708 = vrot.lane.b32.xlu0 %v899_v40, %s909_s12 }
0x11db   : > { %v709_v41 = vpop.permute.xlu0 %708 }
0x11dc   : > { %v711_v43 = vmul.f32 %v709_v41, %v693_v34 }
0x11de   : > { %v718_v44 = vmul.f32 %v716_v42, %v711_v43 }
0x11e0   : > { %720 = vrot.lane.b32.xlu2 %v718_v44, %s910_s13 }
0x123a   : > { %v721_v45 = vpop.permute.xlu2 %720 }
0x123b   : > { %v723_v46 = vsel %vm357_vm2, %v721_v45, 0.0 }
0x123c   : > { %724 = vadd.xlane.f32.xlu0 %v723_v46 }
0x12af   : > { %v725_v48 = vpop.xlane.xlu0 %724 }
0x12b0   : > { %v730_v49 = vadd.f32 %v851_v47, %v725_v48 }
0x12b2   : > { %732 = vst.msk [vmem:[%s251_s19] sm:$0xff] %vm731_vm3, %v730_v49 }
0x12b3 PF: > { %s18_s23 = sadd.s32 1, %s906_s23  }
0x12b4   : > { %p15_p4 = scmp.ge.s32.totalorder %s18_s23, 4  }
0x12b6   :  { %17 = sbr.rel (!%p15_p4) target bundleno = 3 (0x3), region = 81 }

</bundles_post_ra>
